<compile_context>
chip_gen: v6e
topology: v6e:2x2x1
jax: 0.10.0
libtpu: 0.0.40
codegen_flags: <defaults>
</compile_context>

<pallas_src>
import functools

import jax
import jax.numpy as jnp
from jax import lax
from jax.experimental import pallas as pl
from jax.experimental.pallas import tpu as pltpu


def _round_up(n, m):
    return ((n + m - 1) // m) * m


def _cdiv(a, b):
    return -(-a // b)


def _nconv_kernel_single(a_ref, x_ref, o_ref):
    """Single V (reduction) tile: one MXU matmul, direct store. No scratch."""
    # a_ref: (V, tW), x_ref: (V, tL) -> o_ref: (tW, tL). Contract dim 0 of
    # both operands (LHS-transposed matmul): no wrapper transpose of A needed.
    o_ref[...] = lax.dot_general(
        a_ref[...], x_ref[...],
        dimension_numbers=(((0,), (0,)), ((), ())),
        preferred_element_type=jnp.float32,
    ).astype(o_ref.dtype)


def _nconv_kernel_multi(a_ref, x_ref, o_ref):
    """Multi V tile: accumulate directly into the resident f32 output block."""
    k = pl.program_id(2)

    @pl.when(k == 0)
    def _():
        o_ref[...] = jnp.zeros_like(o_ref)

    o_ref[...] += lax.dot_general(
        a_ref[...], x_ref[...],
        dimension_numbers=(((0,), (0,)), ((), ())),
        preferred_element_type=jnp.float32,
    )


@functools.partial(jax.jit, static_argnames=("tl", "tv", "tw", "use_bf16"))
def lstm_nconv(x, A, *, tl=2048, tv=512, tw=512, use_bf16=False):
    """Pallas equivalent of torch.einsum('vl,vw->wl', (x, A)).

    x: (V, L) float32
    A: (V, W) float32
    returns: (W, L) float32  (== A^T @ x)
    """
    V, L = x.shape
    V2, W = A.shape
    assert V == V2, "x and A must share the node dimension V"

    out_dtype = jnp.float32
    if use_bf16:
        # Opt-in: halves HBM traffic on the dominant x stream; MXU still
        # accumulates in f32 via preferred_element_type.
        x = x.astype(jnp.bfloat16)
        A = A.astype(jnp.bfloat16)
    in_bytes = x.dtype.itemsize

    # --- L (lane) tiling: 128-granular, near-equal divisor tiles -----------
    Lp0 = _round_up(L, 128)
    tl128 = max(128, _round_up(tl, 128))
    nL = _cdiv(Lp0, tl128)
    # Free megacore split for v7x (2 TCs): only when it adds zero padding.
    if nL == 1 and Lp0 >= 256 and Lp0 % 256 == 0:
        nL = 2
    tl_e = _round_up(_cdiv(Lp0, nL), 128)
    Lp = nL * tl_e

    # --- V (reduction / sublane) tiling: 8-granular -------------------------
    Vp0 = _round_up(V, 8)
    tv8 = max(8, _round_up(tv, 8))
    nV = _cdiv(Vp0, tv8)
    if nV == 1:
        tv_e, Vp = V, V                       # full extent: no padding at all
    else:
        tv_e = _round_up(_cdiv(Vp0, nV), 8)
        Vp = nV * tv_e

    # --- W tiling: keep W in one full-extent tile when small ----------------
    if W <= max(tw, 8):
        nW, tw_e, Wp = 1, W, W                # full extent: no padding at all
    else:
        Wp0 = _round_up(W, 128)               # W is A-tile lane dim when tiled
        tw128 = max(128, _round_up(tw, 128))
        nW = _cdiv(Wp0, tw128)
        tw_e = _round_up(_cdiv(Wp0, nW), 128)
        Wp = nW * tw_e

    # Zero-pad only when strictly needed. Zeros along V add nothing to the
    # reduction; W/L padding just creates rows/cols sliced away afterwards.
    if (Vp, Lp) != (V, L):
        x = jnp.pad(x, ((0, Vp - V), (0, Lp - L)))
    if (Vp, Wp) != (V, W):
        A = jnp.pad(A, ((0, Vp - V), (0, Wp - W)))

    # Explicit scoped-VMEM limit from the double-buffered tile footprint:
    # lets larger L tiles compile on v5e (16 MiB default) while staying well
    # inside v7x's 64 MiB physical VMEM.
    need = 2 * (tv_e * tw_e * in_bytes + tv_e * tl_e * in_bytes
                + tw_e * tl_e * 4)
    vmem_limit = int(min(max(need * 3 // 2 + (1 << 20), 16 << 20), 56 << 20))

    cost = pl.CostEstimate(
        flops=2 * Vp * Wp * Lp,
        bytes_accessed=in_bytes * (Vp * Lp + Vp * Wp) + 4 * Wp * Lp,
        transcendentals=0,
    )

    if nV == 1:
        # L outermost: x block index is constant over the inner W sweep, so x
        # is DMA'd exactly once per L tile even if W ever needs several tiles.
        grid = (nL, nW)
        kernel = _nconv_kernel_single
        in_specs = [
            pl.BlockSpec((tv_e, tw_e), lambda j, i: (0, i)),   # A tile (V, tW)
            pl.BlockSpec((tv_e, tl_e), lambda j, i: (0, j)),   # x tile (V, tL)
        ]
        out_specs = pl.BlockSpec((tw_e, tl_e), lambda j, i: (i, j))
        dim_sem = ("parallel", "parallel")
    else:
        grid = (nL, nW, nV)                    # reduction axis innermost
        kernel = _nconv_kernel_multi
        in_specs = [
            pl.BlockSpec((tv_e, tw_e), lambda j, i, k: (k, i)),
            pl.BlockSpec((tv_e, tl_e), lambda j, i, k: (k, j)),
        ]
        out_specs = pl.BlockSpec((tw_e, tl_e), lambda j, i, k: (i, j))
        dim_sem = ("parallel", "parallel", "arbitrary")

    out_p = pl.pallas_call(
        kernel,
        out_shape=jax.ShapeDtypeStruct((Wp, Lp), out_dtype),
        grid_spec=pltpu.PrefetchScalarGridSpec(
            num_scalar_prefetch=0,
            grid=grid,
            in_specs=in_specs,
            out_specs=out_specs,
        ),
        compiler_params=pltpu.CompilerParams(
            dimension_semantics=dim_sem,
            vmem_limit_bytes=vmem_limit,
        ),
        cost_estimate=cost,
    )(A, x)

    if (Wp, Lp) != (W, L):
        out_p = out_p[:W, :L]
    return out_p


if __name__ == "__main__":
    key = jax.random.PRNGKey(0)

    # Primary check: small, aligned shapes (single grid step, no padding).
    V, L, W = 32, 128, 16
    kx, ka = jax.random.split(key)
    x = jax.random.normal(kx, (V, L), dtype=jnp.float32)
    A = jax.random.normal(ka, (V, W), dtype=jnp.float32)
    out = jax.block_until_ready(lstm_nconv(x, A))
    ref = jnp.einsum("vl,vw->wl", x, A)
    assert out.shape == (W, L)
    assert jnp.allclose(out, ref, atol=1e-4, rtol=1e-4)

    # Non-aligned shapes on the default fast path (single V tile, no pad).
    V2, L2, W2 = 300, 640, 40
    kx2, ka2 = jax.random.split(ka)
    x2 = jax.random.normal(kx2, (V2, L2), dtype=jnp.float32)
    A2 = jax.random.normal(ka2, (V2, W2), dtype=jnp.float32)
    out2 = jax.block_until_ready(lstm_nconv(x2, A2))
    ref2 = jnp.einsum("vl,vw->wl", x2, A2)
    assert out2.shape == (W2, L2)
    assert jnp.allclose(out2, ref2, atol=1e-3, rtol=1e-3)

    # Force the multi-V-tile accumulation kernel plus the V/W zero-padding
    # and output-slicing paths with small tile caps (3-D grid).
    out3 = jax.block_until_ready(lstm_nconv(x2, A2, tl=128, tv=128, tw=32))
    assert out3.shape == (W2, L2)
    assert jnp.allclose(out3, ref2, atol=1e-3, rtol=1e-3)

    print("KERNEL_OK")
</pallas_src>

<mosaic_0001>
module attributes {stable_mosaic.version = 11 : i64} {
  func.func @_nconv_kernel_single(%arg0: i32, %arg1: i32, %arg2: memref<32x16xf32, #tpu.memory_space<vmem>>, %arg3: memref<32x128xf32, #tpu.memory_space<vmem>>, %arg4: memref<16x128xf32, #tpu.memory_space<vmem>>) attributes {dimension_semantics = [#tpu.dimension_semantics<parallel>, #tpu.dimension_semantics<parallel>], iteration_bounds = array<i64: 1, 1>, scalar_prefetch = 0 : i64, scratch_operands = 0 : i64, tpu.core_type = #tpu.core_type<tc>, window_params = [{transform_indices = @transform_0, window_bounds = array<i64: 32, 16>}, {transform_indices = @transform_1, window_bounds = array<i64: 32, 128>}, {transform_indices = @transform_2, window_bounds = array<i64: 16, 128>}]} {
    %c0 = arith.constant 0 : index
    %c0_0 = arith.constant 0 : index
    %0 = vector.load %arg2[%c0, %c0_0] : memref<32x16xf32, #tpu.memory_space<vmem>>, vector<32x16xf32>
    %c0_1 = arith.constant 0 : index
    %c0_2 = arith.constant 0 : index
    %1 = vector.load %arg3[%c0_1, %c0_2] : memref<32x128xf32, #tpu.memory_space<vmem>>, vector<32x128xf32>
    %cst = arith.constant dense<0.000000e+00> : vector<16x128xf32>
    %2 = tpu.matmul %0, %1, %cst {dimension_numbers = #tpu.dot_dimension_numbers<[0], [0], [1], [1], [0, 1, 1, 1], [], []>} : vector<32x16xf32>, vector<32x128xf32>, vector<16x128xf32> -> vector<16x128xf32>
    %c0_3 = arith.constant 0 : index
    %c0_4 = arith.constant 0 : index
    %3 = vector.load %arg4[%c0_3, %c0_4] : memref<16x128xf32, #tpu.memory_space<vmem>>, vector<16x128xf32>
    tpu.vector_store %arg4[%c0_3, %c0_4], %2 {strides = array<i32>} : memref<16x128xf32, #tpu.memory_space<vmem>>, vector<16x128xf32>,
    return
  }
  func.func @transform_0(%arg0: i32, %arg1: i32) -> (i32, i32) {
    %c0_i32 = arith.constant 0 : i32
    %c0_i32_0 = arith.constant 0 : i32
    return %c0_i32, %arg1 : i32, i32
  }
  func.func @transform_1(%arg0: i32, %arg1: i32) -> (i32, i32) {
    %c0_i32 = arith.constant 0 : i32
    %c0_i32_0 = arith.constant 0 : i32
    return %c0_i32, %arg0 : i32, i32
  }
  func.func @transform_2(%arg0: i32, %arg1: i32) -> (i32, i32) {
    %c0_i32 = arith.constant 0 : i32
    return %arg1, %arg0 : i32, i32
  }
}

</mosaic_0001>

<bundles_post_ra>
// kernel: lstm_nconv.1
= control target key start
LH: loop header
LB: loop body
LE: loop exit
PB: predicated region body
PF: predicated region fallthrough
CT: control target
= control target key end

     0   :  { %s242_s0 = inlined_call_operand.vmem [shape: f32[32,16], index: 0, kind: input, shape index: {}]   ;;  %s243_s1 = inlined_call_operand.vmem [shape: f32[32,128], index: 1, kind: input, shape index: {}]   ;;  %s244_s2 = inlined_call_operand.hbm [shape: f32[16,128], index: 2, kind: output, shape index: {}]  }
   0x1   :  { %v12_v0 = vld [vmem:[%s242_s0] sm:$0xff]  ;;  %v19_v1 = vld [vmem:[%s243_s1 + $0x18] sm:$0xff]  ;;  %v18_v2 = vld [vmem:[%s243_s1 + $0x10] sm:$0xff] }
   0x2   :  { %20 = vxpose.xlu0.b32.start [1/4] (short) (narrow) %v12_v0, 16  ;;  %v13_v3 = vld [vmem:[%s242_s0 + $0x8] sm:$0xff]  ;;  %160 = vmatprep.subr.mxu0 %v19_v1 }
   0x3   :  { %7 = vsyncpa [#allocation3], 0  ;;  %161 = vmatpush3.msra.mxu0 %v19_v1  ;;  %v17_v4 = vld [vmem:[%s243_s1 + $0x8] sm:$0xff]  ;;  %v16_v5 = vld [vmem:[%s243_s1] sm:$0xff]  ;;  %vm52_vm0 = vcmask 261120   ;;  %s197_s1 = smov [#allocation2]  }
   0x4   :  { %162 = vmatprep.subr.mxu0 %v18_v2  ;;  %v14_v6 = vld [vmem:[%s242_s0 + $0x10] sm:$0xff]  ;;  %v15_v7 = vld [vmem:[%s242_s0 + $0x18] sm:$0xff]  ;;  %s141_s25 = sshll.u32 %s197_s1, 4  ;;  %s142_s25 = int_to_ptr.vmem [resolvable:$true] %s141_s25 }
   0x5   :  { %163 = vmatpush3.msra.mxu0 %v18_v2  ;;  %s175_s26 = scalar_lea.vmem %s142_s25, 256  ;;  %p180_p1 = scmp.lt.s32.totalorder %s142_s25, %s142_s25 }
   0x6   :  { %21 = vxpose.xlu0.b32.cont [2/4] (short) (narrow) %v13_v3, 16  ;;  %164 = vmatprep.subr.mxu0 %v17_v4  ;;  %p176_p0 = scmp.ne.s32.totalorder %s142_s25, %s175_s26  ;;  %p181_p2 = scmp.lt.s32.totalorder %s175_s26, %s175_s26 }
   0x7   :  { %165 = vmatpush3.msra.mxu0 %v17_v4 }
   0x8   :  { %166 = vmatprep.subr.mxu0 %v16_v5  ;;  %p182_p3 = por %p181_p2, %p180_p1 }
   0x9   :  { %167 = vmatpush3.msra.mxu0 %v16_v5 }
   0xa   :  { %22 = vxpose.xlu0.b32.cont [3/4] (short) (narrow) %v14_v6, 16  ;;  %p183_p4 = pnand %p182_p3, %p176_p0 }
   0xe   :  { %23 = vxpose.xlu0.b32.end [4/4] (short) (narrow) %v15_v7, 16 }
  0x7e   :  { %v36_v8 = vpop.trf.xlu0 }
  0x7f   :  { %168 = vmatprep.mubr.msk.f32.mxu0 %vm52_vm0, %v36_v8 }
  0x82   :  { %v37_v9 = vpop.trf.xlu0 }
  0x83   :  { %169 = vmatmul.mubr.msk.f32.vlgmr.msra.gmra.mxu0 %vm52_vm0, %v37_v9 }
 0x143   :  { %v170_v10 = vpop.f32.mrf.mxu0 }
 0x144   :  { %135 = vst [vmem:[#allocation2 + $0x8] sm:$0xff] %v170_v10 }
 0x145   :  { %v125_v11 = vpop.f32.mrf.mxu0 }
 0x146   :  { %134 = vst [vmem:[#allocation2] sm:$0xff] %v125_v11 }
 0x147   :  { %186 = shalt.err (!%p183_p4)
}
 0x148   :  { %s198_s0 = smov 128   ;;  %s199_s27 = smov 8  }
 0x149   :  { %147 = dma.vmem_to_hbm [thread:$0]  %s142_s25, 256, %s244_s2, [#allocation3], %s198_s0, %s198_s0, %s199_s27  }
 0x14a   :  { %195 = dma.done.wait [#allocation3], 256  }
 0x14b   :  { %196 = vsyncadd [#allocation3], 4294967040 }
 0x14c   :  { %151 = vsyncpa [#allocation3], 1 }

</bundles_post_ra>
